<compile_context>
chip_gen: v5e
topology: v5e:2x2
jax: 0.10.0
libtpu: 0.0.40
codegen_flags: <defaults>
</compile_context>

<pallas_src>
import jax
import jax.numpy as jnp
from jax.experimental import pallas as pl
from jax.experimental.pallas import tpu as pltpu

LANE = 128
SUB = 8  # x / out stay f32 in HBM -> 8-row sublane granule for the batch tile


def _round_up(x, m):
    return (x + m - 1) // m * m


def qnetwork_kernel(x_ref, w1_ref, b1_ref, w2_ref, b2_ref, w3_ref, b3_ref, o_ref):
    """Fused 3-layer MLP on one batch tile. f32 MXU accumulation throughout."""
    # Per-tile cast to the weight compute dtype (bf16 by default); no-op for f32.
    x = x_ref[...].astype(w1_ref.dtype)
    # Layer 1: Linear + ReLU
    h1 = jnp.dot(x, w1_ref[...], preferred_element_type=jnp.float32)
    h1 = jnp.maximum(h1 + b1_ref[...], 0.0)
    # Layer 2: Linear + ReLU
    h2 = jnp.dot(h1.astype(w2_ref.dtype), w2_ref[...],
                 preferred_element_type=jnp.float32)
    h2 = jnp.maximum(h2 + b2_ref[...], 0.0)
    # Layer 3: Linear (Q-values). w3 is lane-padded for a clean MXU pass; only
    # the real A columns are biased and stored (narrow, unpadded output stream).
    q = jnp.dot(h2.astype(w3_ref.dtype), w3_ref[...],
                preferred_element_type=jnp.float32)
    a = o_ref.shape[-1]
    o_ref[...] = (q[:, :a] + b3_ref[...]).astype(o_ref.dtype)


def prepare_params(params, compute_dtype=jnp.bfloat16):
    """One-time pad/cast of the weights (hoisted out of the per-step forward).

    Hidden dim is zero-padded to a multiple of 128 lanes (exact no-op through
    matmul + ReLU); w3's output dim is lane-padded too, but the kernel only
    stores the real A columns.  Biases stay float32.
    """
    w1, b1, w2, b2, w3, b3 = params
    S, H = w1.shape
    A = w3.shape[1]
    Hp = _round_up(max(H, LANE), LANE)
    Ap = _round_up(max(A, LANE), LANE)

    def pad2(a, rows, cols, dtype):
        return jnp.pad(a, ((0, rows - a.shape[0]), (0, cols - a.shape[1]))).astype(dtype)

    w1p = pad2(w1, S, Hp, compute_dtype)
    w2p = pad2(w2, Hp, Hp, compute_dtype)
    w3p = pad2(w3, Hp, Ap, compute_dtype)
    b1p = pad2(b1.reshape(1, -1), 1, Hp, jnp.float32)
    b2p = pad2(b2.reshape(1, -1), 1, Hp, jnp.float32)
    b3f = b3.reshape(1, A).astype(jnp.float32)
    return (w1p, b1p, w2p, b2p, w3p, b3f)


def qnetwork_forward(x, prepared_params, *, block_b=2048):
    """Fused 3-layer MLP forward.

    x: (B, state_space) float32. prepared_params: output of prepare_params().
    Returns (B, action_space) float32.
    """
    w1p, b1p, w2p, b2p, w3p, b3 = prepared_params
    B, S = x.shape
    assert w1p.shape[0] == S, "state_space mismatch between x and params"
    Hp = w1p.shape[1]
    Ap = w3p.shape[1]
    A = b3.shape[1]

    # Batch padding: only to the 8-row sublane granule (cheap / usually a no-op).
    Bp = _round_up(B, SUB)
    x_in = x if Bp == B else jnp.pad(x, ((0, Bp - B), (0, 0)))

    # Tile size: large enough to amortize per-step overhead, small enough that
    # batches > 512 rows produce >= 2 grid steps (both v7x TensorCores engage).
    TB = min(_round_up(block_b, SUB),
             max(512, _round_up(pl.cdiv(Bp, 2), SUB)),
             Bp)
    grid = (pl.cdiv(Bp, TB),)

    weight_bytes = sum(int(a.size) * a.dtype.itemsize for a in prepared_params)
    cost = pl.CostEstimate(
        flops=2 * Bp * (S * Hp + Hp * Hp + Hp * Ap),
        bytes_accessed=int(x_in.size) * x_in.dtype.itemsize + weight_bytes + Bp * A * 4,
        transcendentals=0,
    )

    const2 = lambda i: (0, 0)

    out = pl.pallas_call(
        qnetwork_kernel,
        out_shape=jax.ShapeDtypeStruct((Bp, A), jnp.float32),
        grid=grid,
        in_specs=[
            pl.BlockSpec((TB, S), lambda i: (i, 0)),   # streamed batch tile (f32)
            pl.BlockSpec((S, Hp), const2),             # weights/biases: VMEM-resident
            pl.BlockSpec((1, Hp), const2),
            pl.BlockSpec((Hp, Hp), const2),
            pl.BlockSpec((1, Hp), const2),
            pl.BlockSpec((Hp, Ap), const2),
            pl.BlockSpec((1, A), const2),
        ],
        out_specs=pl.BlockSpec((TB, A), lambda i: (i, 0)),   # narrow, unpadded Q-values
        compiler_params=pltpu.CompilerParams(
            dimension_semantics=("parallel",)),        # megacore sharding on v7x
        cost_estimate=cost,
    )(x_in, w1p, b1p, w2p, b2p, w3p, b3)

    return out[:B] if Bp != B else out


def init_params(key, state_space, hidden, action_space):
    """Deterministic init mimicking torch.nn.Linear (uniform +/- 1/sqrt(fan_in)).
    Weights stored as (in, out)."""
    def linear_init(k, fan_in, fan_out):
        kw, kb = jax.random.split(k)
        bound = 1.0 / jnp.sqrt(fan_in)
        w = jax.random.uniform(kw, (fan_in, fan_out), jnp.float32, -bound, bound)
        b = jax.random.uniform(kb, (1, fan_out), jnp.float32, -bound, bound)
        return w, b

    k1, k2, k3 = jax.random.split(key, 3)
    w1, b1 = linear_init(k1, state_space, hidden)
    w2, b2 = linear_init(k2, hidden, hidden)
    w3, b3 = linear_init(k3, hidden, action_space)
    return (w1, b1, w2, b2, w3, b3)


def reference_forward(x, params):
    """Pure-JAX f32 reference for validation."""
    w1, b1, w2, b2, w3, b3 = params
    h1 = jnp.maximum(x @ w1 + b1, 0.0)
    h2 = jnp.maximum(h1 @ w2 + b2, 0.0)
    return h2 @ w3 + b3


# TODO(synk): QNetwork.act() (epsilon-greedy sampling / env interaction) is host-side
# control flow, not a tensor op; only forward() is implemented as a kernel.

if __name__ == "__main__":
    # Small shapes consistent with a DQN Q-network.
    batch, state_space, hidden, action_space = 8, 16, 32, 4

    key = jax.random.PRNGKey(0)
    k_params, k_x, k_x2 = jax.random.split(key, 3)
    params = init_params(k_params, state_space, hidden, action_space)
    x = jax.random.normal(k_x, (batch, state_space), jnp.float32)

    # 1) Exact (f32) compute path.
    prep_f32 = prepare_params(params, compute_dtype=jnp.float32)
    q = qnetwork_forward(x, prep_f32)
    q = jax.block_until_ready(q)
    q_ref = reference_forward(x, params)
    assert q.shape == (batch, action_space)
    assert jnp.allclose(q, q_ref, atol=1e-5, rtol=1e-5), "f32 mismatch vs JAX reference"

    # 2) Default bf16 compute path: ragged batch (not a multiple of 8 or of the
    #    tile), small block_b to force a multi-step grid with resident weights.
    batch2 = 45
    x2 = jax.random.normal(k_x2, (batch2, state_space), jnp.float32)
    prep_bf16 = prepare_params(params)                     # bf16 default
    q2 = qnetwork_forward(x2, prep_bf16, block_b=16)
    q2 = jax.block_until_ready(q2)
    q2_ref = reference_forward(x2, params)
    assert q2.shape == (batch2, action_space)
    assert jnp.allclose(q2, q2_ref, atol=5e-2, rtol=5e-2), "bf16 mismatch vs JAX reference"

    print("KERNEL_OK")
</pallas_src>

<mosaic_0001>
module attributes {stable_mosaic.version = 11 : i64} {
  func.func @qnetwork_kernel(%arg0: i32, %arg1: memref<8x16xf32, #tpu.memory_space<vmem>>, %arg2: memref<16x128xf32, #tpu.memory_space<vmem>>, %arg3: memref<1x128xf32, #tpu.memory_space<vmem>>, %arg4: memref<128x128xf32, #tpu.memory_space<vmem>>, %arg5: memref<1x128xf32, #tpu.memory_space<vmem>>, %arg6: memref<128x128xf32, #tpu.memory_space<vmem>>, %arg7: memref<1x4xf32, #tpu.memory_space<vmem>>, %arg8: memref<8x4xf32, #tpu.memory_space<vmem>>) attributes {dimension_semantics = [#tpu.dimension_semantics<parallel>], iteration_bounds = array<i64: 1>, scalar_prefetch = 0 : i64, scratch_operands = 0 : i64, tpu.core_type = #tpu.core_type<tc>, window_params = [{transform_indices = @transform_0, window_bounds = array<i64: 8, 16>}, {pipeline_mode = #tpu.pipeline_mode<synchronous>, transform_indices = @transform_1, window_bounds = array<i64: 16, 128>}, {pipeline_mode = #tpu.pipeline_mode<synchronous>, transform_indices = @transform_2, window_bounds = array<i64: 1, 128>}, {pipeline_mode = #tpu.pipeline_mode<synchronous>, transform_indices = @transform_3, window_bounds = array<i64: 128, 128>}, {pipeline_mode = #tpu.pipeline_mode<synchronous>, transform_indices = @transform_4, window_bounds = array<i64: 1, 128>}, {pipeline_mode = #tpu.pipeline_mode<synchronous>, transform_indices = @transform_5, window_bounds = array<i64: 128, 128>}, {pipeline_mode = #tpu.pipeline_mode<synchronous>, transform_indices = @transform_6, window_bounds = array<i64: 1, 4>}, {transform_indices = @transform_7, window_bounds = array<i64: 8, 4>}]} {
    %c0 = arith.constant 0 : index
    %c0_0 = arith.constant 0 : index
    %0 = vector.load %arg1[%c0, %c0_0] : memref<8x16xf32, #tpu.memory_space<vmem>>, vector<8x16xf32>
    %c0_1 = arith.constant 0 : index
    %c0_2 = arith.constant 0 : index
    %1 = vector.load %arg2[%c0_1, %c0_2] : memref<16x128xf32, #tpu.memory_space<vmem>>, vector<16x128xf32>
    %cst = arith.constant dense<0.000000e+00> : vector<8x128xf32>
    %2 = tpu.matmul %0, %1, %cst {dimension_numbers = #tpu.dot_dimension_numbers<[1], [0], [0], [1], [0, 0, 1, 1], [], []>} : vector<8x16xf32>, vector<16x128xf32>, vector<8x128xf32> -> vector<8x128xf32>
    %c0_3 = arith.constant 0 : index
    %c0_4 = arith.constant 0 : index
    %3 = vector.load %arg3[%c0_3, %c0_4] : memref<1x128xf32, #tpu.memory_space<vmem>>, vector<1x128xf32>
    %4 = vector.broadcast %3 : vector<1x128xf32> to vector<8x128xf32>
    %5 = arith.addf %2, %4 : vector<8x128xf32>
    %cst_5 = arith.constant 0.000000e+00 : f32
    %6 = vector.broadcast %cst_5 : f32 to vector<8x128xf32>
    %7 = arith.maximumf %5, %6 : vector<8x128xf32>
    %c0_6 = arith.constant 0 : index
    %c0_7 = arith.constant 0 : index
    %8 = vector.load %arg4[%c0_6, %c0_7] : memref<128x128xf32, #tpu.memory_space<vmem>>, vector<128x128xf32>
    %cst_8 = arith.constant dense<0.000000e+00> : vector<8x128xf32>
    %9 = tpu.matmul %7, %8, %cst_8 {dimension_numbers = #tpu.dot_dimension_numbers<[1], [0], [0], [1], [0, 0, 1, 1], [], []>} : vector<8x128xf32>, vector<128x128xf32>, vector<8x128xf32> -> vector<8x128xf32>
    %c0_9 = arith.constant 0 : index
    %c0_10 = arith.constant 0 : index
    %10 = vector.load %arg5[%c0_9, %c0_10] : memref<1x128xf32, #tpu.memory_space<vmem>>, vector<1x128xf32>
    %11 = vector.broadcast %10 : vector<1x128xf32> to vector<8x128xf32>
    %12 = arith.addf %9, %11 : vector<8x128xf32>
    %cst_11 = arith.constant 0.000000e+00 : f32
    %13 = vector.broadcast %cst_11 : f32 to vector<8x128xf32>
    %14 = arith.maximumf %12, %13 : vector<8x128xf32>
    %c0_12 = arith.constant 0 : index
    %c0_13 = arith.constant 0 : index
    %15 = vector.load %arg6[%c0_12, %c0_13] : memref<128x128xf32, #tpu.memory_space<vmem>>, vector<128x128xf32>
    %cst_14 = arith.constant dense<0.000000e+00> : vector<8x128xf32>
    %16 = tpu.matmul %14, %15, %cst_14 {dimension_numbers = #tpu.dot_dimension_numbers<[1], [0], [0], [1], [0, 0, 1, 1], [], []>} : vector<8x128xf32>, vector<128x128xf32>, vector<8x128xf32> -> vector<8x128xf32>
    %17 = vector.extract_strided_slice %16 {offsets = [0, 0], sizes = [8, 4], strides = [1, 1]} : vector<8x128xf32> to vector<8x4xf32>
    %c0_15 = arith.constant 0 : index
    %c0_16 = arith.constant 0 : index
    %18 = vector.load %arg7[%c0_15, %c0_16] : memref<1x4xf32, #tpu.memory_space<vmem>>, vector<1x4xf32>
    %19 = vector.broadcast %18 : vector<1x4xf32> to vector<8x4xf32>
    %20 = arith.addf %17, %19 : vector<8x4xf32>
    %c0_17 = arith.constant 0 : index
    %c0_18 = arith.constant 0 : index
    %21 = vector.load %arg8[%c0_17, %c0_18] : memref<8x4xf32, #tpu.memory_space<vmem>>, vector<8x4xf32>
    tpu.vector_store %arg8[%c0_17, %c0_18], %20 {strides = array<i32>} : memref<8x4xf32, #tpu.memory_space<vmem>>, vector<8x4xf32>,
    return
  }
  func.func @transform_0(%arg0: i32) -> (i32, i32) {
    %c0_i32 = arith.constant 0 : i32
    %c0_i32_0 = arith.constant 0 : i32
    return %arg0, %c0_i32 : i32, i32
  }
  func.func @transform_1(%arg0: i32) -> (i32, i32) {
    %c0_i32 = arith.constant 0 : i32
    %c0_i32_0 = arith.constant 0 : i32
    %c0_i32_1 = arith.constant 0 : i32
    return %c0_i32, %c0_i32_0 : i32, i32
  }
  func.func @transform_2(%arg0: i32) -> (i32, i32) {
    %c0_i32 = arith.constant 0 : i32
    %c0_i32_0 = arith.constant 0 : i32
    %c0_i32_1 = arith.constant 0 : i32
    return %c0_i32, %c0_i32_0 : i32, i32
  }
  func.func @transform_3(%arg0: i32) -> (i32, i32) {
    %c0_i32 = arith.constant 0 : i32
    %c0_i32_0 = arith.constant 0 : i32
    %c0_i32_1 = arith.constant 0 : i32
    return %c0_i32, %c0_i32_0 : i32, i32
  }
  func.func @transform_4(%arg0: i32) -> (i32, i32) {
    %c0_i32 = arith.constant 0 : i32
    %c0_i32_0 = arith.constant 0 : i32
    %c0_i32_1 = arith.constant 0 : i32
    return %c0_i32, %c0_i32_0 : i32, i32
  }
  func.func @transform_5(%arg0: i32) -> (i32, i32) {
    %c0_i32 = arith.constant 0 : i32
    %c0_i32_0 = arith.constant 0 : i32
    %c0_i32_1 = arith.constant 0 : i32
    return %c0_i32, %c0_i32_0 : i32, i32
  }
  func.func @transform_6(%arg0: i32) -> (i32, i32) {
    %c0_i32 = arith.constant 0 : i32
    %c0_i32_0 = arith.constant 0 : i32
    %c0_i32_1 = arith.constant 0 : i32
    return %c0_i32, %c0_i32_0 : i32, i32
  }
  func.func @transform_7(%arg0: i32) -> (i32, i32) {
    %c0_i32 = arith.constant 0 : i32
    %c0_i32_0 = arith.constant 0 : i32
    return %arg0, %c0_i32 : i32, i32
  }
}

</mosaic_0001>

<bundles_post_ra>
// kernel: tpu_custom_call.1
= control target key start
LH: loop header
LB: loop body
LE: loop exit
PB: predicated region body
PF: predicated region fallthrough
CT: control target
= control target key end

     0   :  { %12 = vsyncpa [#allocation3], 0  ;;  %s392_s0 = inlined_call_operand.hbm [shape: f32[8,16], index: 0, kind: input, shape index: {}]   ;;  %s393_s1 = inlined_call_operand.hbm [shape: f32[16,128], index: 1, kind: input, shape index: {}]   ;;  %s394_s2 = inlined_call_operand.vmem [shape: f32[1,128], index: 2, kind: input, shape index: {}]   ;;  %s395_s3 = inlined_call_operand.hbm [shape: f32[128,128], index: 3, kind: input, shape index: {}]   ;;  %s396_s4 = inlined_call_operand.vmem [shape: f32[1,128], index: 4, kind: input, shape index: {}]   ;;  %s397_s5 = inlined_call_operand.hbm [shape: f32[128,128], index: 5, kind: input, shape index: {}]   ;;  %s398_s6 = inlined_call_operand.vmem [shape: f32[1,4], index: 6, kind: input, shape index: {}]   ;;  %s399_s7 = inlined_call_operand.vmem [shape: f32[8,4], index: 7, kind: output, shape index: {}]  }
   0x1   :  { %13 = vsyncpa [#allocation5], 0  ;;  %s30_s26 = sshll.u32 %s393_s1, 4  ;;  %s31_s26 = int_to_ptr.hbm [resolvable:$true] %s30_s26 }
   0x2   :  { %14 = vsyncpa [#allocation8], 0  ;;  %s322_s27 = smov [#allocation4]   ;;  %s20_s8 = sshll.u32 %s392_s0, 4  ;;  %s21_s8 = int_to_ptr.hbm [resolvable:$true] %s20_s8 }
   0x3   :  { %s32_s28 = sshll.u32 %s322_s27, 4  ;;  %s323_s9 = smov 128   ;;  %s33_s28 = int_to_ptr.vmem [resolvable:$true] %s32_s28 }
   0x4   :  { %s324_s10 = smov 8   ;;  %s325_s11 = smov [#allocation2]  }
   0x5   :  { %38 = dma.hbm_to_vmem [thread:$0]  %s31_s26, 256, %s33_s28, [#allocation5], %s323_s9, %s323_s9, %s324_s10  }
   0x6   :  { %s22_s12 = sshll.u32 %s325_s11, 4  ;;  %s45_s15 = sshll.u32 %s395_s3, 4  ;;  %s23_s12 = int_to_ptr.vmem [resolvable:$true] %s22_s12  ;;  %s46_s15 = int_to_ptr.hbm [resolvable:$true] %s45_s15 }
   0x7   :  { %25 = dma.hbm_to_vmem [thread:$0]  %s21_s8, 128, %s23_s12, [#allocation3]  }
   0x8   :  { %s60_s17 = sshll.u32 %s397_s5, 4  ;;  %s326_s18 = smov [#allocation6]   ;;  %s61_s17 = int_to_ptr.hbm [resolvable:$true] %s60_s17 }
   0x9   :  { %s47_s19 = sshll.u32 %s326_s18, 4  ;;  %s327_s0 = smov [#allocation7]   ;;  %s48_s19 = int_to_ptr.vmem [resolvable:$true] %s47_s19 }
   0xa   :  { %53 = dma.hbm_to_vmem [thread:$0]  %s46_s15, 2048, %s48_s19, [#allocation5], %s323_s9, %s323_s9, %s324_s10  }
   0xb   :  { %s62_s20 = sshll.u32 %s327_s0, 4  ;;  %s63_s20 = int_to_ptr.vmem [resolvable:$true] %s62_s20 }
   0xc   :  { %68 = dma.hbm_to_vmem [thread:$0]  %s61_s17, 2048, %s63_s20, [#allocation8], %s323_s9, %s323_s9, %s324_s10  }
   0xd   :  { %316 = dma.done.wait [#allocation3], 128  }
   0xe   :  { %317 = vsyncadd [#allocation3], 4294967168 }
   0xf   :  { %318 = dma.done.wait [#allocation5], 2304  }
  0x10   :  { %319 = vsyncadd [#allocation5], 4294964992 }
  0x11   :  { %320 = dma.done.wait [#allocation8], 2048  }
  0x12   :  { %321 = vsyncadd [#allocation8], 4294965248  ;;  %v89_v0 = vld [vmem:[#allocation4 + $0x8] sm:$0xff]  ;;  %v88_v1 = vld [vmem:[#allocation4] sm:$0xff]  ;;  %vm94_vm0 = vcmask 130048   ;;  %vm201_vm1 = vcmask 31744  }
  0x13   :  { %112 = vmatpush.msra.mxu0 %v89_v0  ;;  %v87_v2 = vld [vmem:[#allocation2] sm:$0xff]  ;;  %v134_v3 = vld [vmem:[#allocation6 + $0x78] sm:$0xff]  ;;  %v133_v4 = vld [vmem:[#allocation6 + $0x70] sm:$0xff] }
  0x14   :  { %139 = vmatpush.msra.mxu1 %v134_v3  ;;  %v132_v5 = vld [vmem:[#allocation6 + $0x68] sm:$0xff]  ;;  %v131_v6 = vld [vmem:[#allocation6 + $0x60] sm:$0xff]  ;;  %v130_v7 = vld [vmem:[#allocation6 + $0x58] sm:$0xff] }
  0x15   :  { %113 = vmatpush.msra.mxu0 %v88_v1  ;;  %v129_v8 = vld [vmem:[#allocation6 + $0x50] sm:$0xff]  ;;  %v128_v9 = vld [vmem:[#allocation6 + $0x48] sm:$0xff]  ;;  %v127_v10 = vld [vmem:[#allocation6 + $0x40] sm:$0xff] }
  0x16   :  { %210 = vmatmul.msk.f32.vlgmr.msra.gmra.mxu0 %vm94_vm0, %v87_v2  ;;  %140 = vmatpush.msra.mxu1 %v133_v4  ;;  %v126_v11 = vld [vmem:[#allocation6 + $0x38] sm:$0xff]  ;;  %v125_v12 = vld [vmem:[#allocation6 + $0x30] sm:$0xff]  ;;  %v124_v13 = vld [vmem:[#allocation6 + $0x28] sm:$0xff] }
  0x17   :  { %v123_v14 = vld [vmem:[#allocation6 + $0x20] sm:$0xff]  ;;  %v122_v15 = vld [vmem:[#allocation6 + $0x18] sm:$0xff]  ;;  %v121_v16 = vld [vmem:[#allocation6 + $0x10] sm:$0xff] }
  0x18   :  { %141 = vmatpush.msra.mxu1 %v132_v5  ;;  %v120_v17 = vld [vmem:[#allocation6 + $0x8] sm:$0xff]  ;;  %v119_v18 = vld [vmem:[#allocation6] sm:$0xff]  ;;  %v175_v19 = vld [vmem:[#allocation7 + $0x78] sm:$0xff] }
  0x19   :  { %v174_v20 = vld [vmem:[#allocation7 + $0x70] sm:$0xff]  ;;  %176 = vmatpush.msra.mxu2 %v175_v19  ;;  %v173_v21 = vld [vmem:[#allocation7 + $0x68] sm:$0xff]  ;;  %v172_v22 = vld [vmem:[#allocation7 + $0x60] sm:$0xff] }
  0x1a   :  { %142 = vmatpush.msra.mxu1 %v131_v6  ;;  %v171_v23 = vld [vmem:[#allocation7 + $0x58] sm:$0xff]  ;;  %v170_v24 = vld [vmem:[#allocation7 + $0x50] sm:$0xff]  ;;  %v169_v25 = vld [vmem:[#allocation7 + $0x48] sm:$0xff] }
  0x1b   :  { %177 = vmatpush.msra.mxu2 %v174_v20  ;;  %v168_v26 = vld [vmem:[#allocation7 + $0x40] sm:$0xff]  ;;  %v167_v27 = vld [vmem:[#allocation7 + $0x38] sm:$0xff]  ;;  %v166_v28 = vld [vmem:[#allocation7 + $0x30] sm:$0xff] }
  0x1c   :  { %143 = vmatpush.msra.mxu1 %v130_v7  ;;  %v165_v29 = vld [vmem:[#allocation7 + $0x28] sm:$0xff]  ;;  %v164_v30 = vld [vmem:[#allocation7 + $0x20] sm:$0xff]  ;;  %v163_v31 = vld [vmem:[#allocation7 + $0x18] sm:$0xff] }
  0x1d   :  { %178 = vmatpush.msra.mxu2 %v173_v21  ;;  %v217_v32 = vld [vmem:[%s394_s2] ss:$0 sm:$0xff]  ;;  %v162_v36 = vld [vmem:[#allocation7 + $0x10] sm:$0xff]  ;;  %v160_v38 = vld [vmem:[#allocation7] sm:$0xff] }
  0x1e   :  { %144 = vmatpush.msra.mxu1 %v129_v8  ;;  %v161_v37 = vld [vmem:[#allocation7 + $0x8] sm:$0xff] }
  0x1f   :  { %179 = vmatpush.msra.mxu2 %v172_v22  ;;  %v218_v39 = vld [vmem:[%s396_s4] ss:$0 sm:$0xff] }
  0x20   :  { %145 = vmatpush.msra.mxu1 %v128_v9  ;;  %v219_v43 = vld [vmem:[%s398_s6] ss:$0 sm:$0xff] }
  0x21   :  { %180 = vmatpush.msra.mxu2 %v171_v23 }
  0x22   :  { %146 = vmatpush.msra.mxu1 %v127_v10 }
  0x23   :  { %181 = vmatpush.msra.mxu2 %v170_v24 }
  0x24   :  { %147 = vmatpush.msra.mxu1 %v126_v11 }
  0x25   :  { %182 = vmatpush.msra.mxu2 %v169_v25 }
  0x26   :  { %148 = vmatpush.msra.mxu1 %v125_v12 }
  0x27   :  { %183 = vmatpush.msra.mxu2 %v168_v26 }
  0x28   :  { %149 = vmatpush.msra.mxu1 %v124_v13 }
  0x29   :  { %184 = vmatpush.msra.mxu2 %v167_v27 }
  0x2a   :  { %150 = vmatpush.msra.mxu1 %v123_v14 }
  0x2b   :  { %185 = vmatpush.msra.mxu2 %v166_v28 }
  0x2c   :  { %151 = vmatpush.msra.mxu1 %v122_v15 }
  0x2d   :  { %186 = vmatpush.msra.mxu2 %v165_v29 }
  0x2e   :  { %152 = vmatpush.msra.mxu1 %v121_v16 }
  0x2f   :  { %187 = vmatpush.msra.mxu2 %v164_v30 }
  0x30   :  { %153 = vmatpush.msra.mxu1 %v120_v17 }
  0x31   :  { %188 = vmatpush.msra.mxu2 %v163_v31 }
  0x32   :  { %154 = vmatpush.msra.mxu1 %v119_v18 }
  0x33   :  { %189 = vmatpush.msra.mxu2 %v162_v36 }
  0x35   :  { %190 = vmatpush.msra.mxu2 %v161_v37 }
  0x37   :  { %191 = vmatpush.msra.mxu2 %v160_v38 }
  0x93   :  { %v115_v33 = vpop.f32.mrf.mxu0 }
  0x94   :  { %v116_v34 = vadd.f32 %v217_v32, %v115_v33 }
  0x96   :  { %v118_v35 = vmax.f32 %v116_v34, 0.0 }
  0x98   :  { %155 = vmatmul.f32.vlgmr.msra.gmra.mxu1 %v118_v35 }
 0x115   :  { %v156_v40 = vpop.f32.mrf.mxu1 }
 0x116   :  { %v157_v41 = vadd.f32 %v218_v39, %v156_v40 }
 0x118   :  { %v159_v42 = vmax.f32 %v157_v41, 0.0 }
 0x11a   :  { %192 = vmatmul.f32.vlgmr.msra.gmra.mxu2 %v159_v42 }
 0x19d   :  { %v193_v44 = vpop.f32.mrf.mxu2 }
 0x19e   :  { %v200_v45 = vadd.f32 %v219_v43, %v193_v44 }
 0x1a0   :  { %202 = vst.msk [vmem:[%s399_s7] sm:$0xff] %vm201_vm1, %v200_v45 }
 0x1a1   :  { %207 = vsyncpa [#allocation3], 1 }
 0x1a2   :  { %208 = vsyncpa [#allocation5], 1 }
 0x1a3   :  { %209 = vsyncpa [#allocation8], 1 }

</bundles_post_ra>
